<compile_context>
chip_gen: v7x
topology: tpu7x:2x2x1
jax: 0.10.0
libtpu: 0.0.40
codegen_flags: <defaults>
</compile_context>

<pallas_src>
import jax
import jax.numpy as jnp
from jax.experimental import pallas as pl
from jax.experimental.pallas import tpu as pltpu


def qnetwork_kernel(x_ref, wih_ref, whh_ref, b_ref,
                    w1_ref, b1_ref, w2_ref, b2_ref, out_ref):
    """Full forward pass for one batch, all tensors resident in VMEM.

    x_ref   : (B, T, S)  bf16   batch-first input sequence
    wih_ref : (S, 4H)    bf16   LSTM input->gates weights (transposed)
    whh_ref : (H, 4H)    bf16   LSTM hidden->gates weights (transposed)
    b_ref   : (1, 4H)    f32    b_ih + b_hh (pre-summed)
    w1_ref  : (H, F)     bf16   fc1 weight (transposed)
    b1_ref  : (1, F)     f32
    w2_ref  : (F, A)     bf16   fc2 weight (transposed)
    b2_ref  : (1, A)     f32
    out_ref : (B, A)     f32
    """
    B, T, S = x_ref.shape
    H = whh_ref.shape[0]

    x = x_ref[...]                                       # (B, T, S) bf16
    wih = wih_ref[...]                                   # (S, 4H)   bf16
    whh = whh_ref[...]                                   # (H, 4H)   bf16
    b = b_ref[...]                                       # (1, 4H)   f32

    # Hoisted input projection: one MXU matmul covering every timestep,
    # biases folded in.  gx[:, t, :] is the x-contribution to step t's gates.
    gx = jnp.einsum('bts,sg->btg', x, wih,
                    preferred_element_type=jnp.float32) + b   # (B, T, 4H) f32

    h = jnp.zeros((B, H), jnp.float32)
    c = jnp.zeros((B, H), jnp.float32)

    # Fully unrolled recurrence (T is a static Python int at trace time).
    for t in range(T):
        gates = gx[:, t, :] + jnp.dot(h.astype(jnp.bfloat16), whh,
                                      preferred_element_type=jnp.float32)  # (B, 4H) f32
        # Full-width transcendentals, then slice the results.
        sig = jax.nn.sigmoid(gates)
        tnh = jnp.tanh(gates)
        # PyTorch LSTM gate order: i, f, g, o
        i_g = sig[:, 0 * H:1 * H]
        f_g = sig[:, 1 * H:2 * H]
        g_g = tnh[:, 2 * H:3 * H]
        o_g = sig[:, 3 * H:4 * H]
        c = f_g * c + i_g * g_g                          # f32 state
        h = o_g * jnp.tanh(c)                            # f32 state

    # fc1 + ReLU
    z1 = jnp.dot(h.astype(jnp.bfloat16), w1_ref[...],
                 preferred_element_type=jnp.float32) + b1_ref[...]
    z1 = jnp.maximum(z1, 0.0)

    # dropout: eval-mode -> identity (no RNG applied)

    # fc2 + ReLU
    z2 = jnp.dot(z1.astype(jnp.bfloat16), w2_ref[...],
                 preferred_element_type=jnp.float32) + b2_ref[...]
    z2 = jnp.maximum(z2, 0.0)

    out_ref[...] = z2.astype(out_ref.dtype)


def prepare_params(params):
    """One-time conversion to kernel layout: transpose to (in, out), pre-sum the
    LSTM biases, and cast matmul operands to bf16.  Do this outside the hot path."""
    return {
        "wih_t": params["w_ih"].T.astype(jnp.bfloat16),              # (S, 4H)
        "whh_t": params["w_hh"].T.astype(jnp.bfloat16),              # (H, 4H)
        "b": (params["b_ih"] + params["b_hh"])[None, :].astype(jnp.float32),
        "w1_t": params["w_fc1"].T.astype(jnp.bfloat16),              # (H, F)
        "b1": params["b_fc1"][None, :].astype(jnp.float32),          # (1, F)
        "w2_t": params["w_fc2"].T.astype(jnp.bfloat16),              # (F, A)
        "b2": params["b_fc2"][None, :].astype(jnp.float32),          # (1, A)
    }


@jax.jit
def qnetwork_forward(state, prep):
    """state: (B, T, S) or (T, S) float32 (batch-first, like the PyTorch module)."""
    if state.ndim == 2:
        state = state[None, ...]
    B, T, S = state.shape
    x = state.astype(jnp.bfloat16)       # batch-first; no time-major HBM transpose

    A = prep["w2_t"].shape[1]
    vmem = pl.BlockSpec(memory_space=pltpu.MemorySpace.VMEM)

    # Single program, whole arrays VMEM-resident (working set ~0.2 MiB).
    # TODO(synk): for large serving batches add a batch-tiled grid with
    # dimension_semantics=("parallel",) to engage both TensorCores on v7x.
    return pl.pallas_call(
        qnetwork_kernel,
        out_shape=jax.ShapeDtypeStruct((B, A), jnp.float32),
        in_specs=[vmem] * 8,
        out_specs=vmem,
    )(x, prep["wih_t"], prep["whh_t"], prep["b"],
      prep["w1_t"], prep["b1"], prep["w2_t"], prep["b2"])


def init_params(key, state_size, action_size, lstm_hidden_size=64, fc_units=128):
    """Deterministic synthetic init mirroring the module's parameter shapes."""
    ks = jax.random.split(key, 4)
    H, S, F, A = lstm_hidden_size, state_size, fc_units, action_size

    def xavier(k, shape):
        fan_out, fan_in = shape
        limit = jnp.sqrt(6.0 / (fan_in + fan_out))
        return jax.random.uniform(k, shape, jnp.float32, -limit, limit)

    def kaiming(k, shape):
        fan_in = shape[1]
        limit = jnp.sqrt(6.0 / fan_in)
        return jax.random.uniform(k, shape, jnp.float32, -limit, limit)

    return {
        "w_ih": xavier(ks[0], (4 * H, S)),      # LSTM weight_ih_l0
        "w_hh": xavier(ks[1], (4 * H, H)),      # LSTM weight_hh_l0
        "b_ih": jnp.zeros((4 * H,), jnp.float32),
        "b_hh": jnp.zeros((4 * H,), jnp.float32),
        "w_fc1": kaiming(ks[2], (F, H)),        # fc1.weight
        "b_fc1": jnp.zeros((F,), jnp.float32),
        "w_fc2": kaiming(ks[3], (A, F)),        # fc2.weight
        "b_fc2": jnp.zeros((A,), jnp.float32),
    }


if __name__ == "__main__":
    key = jax.random.PRNGKey(0)
    k_param, k_state = jax.random.split(key)

    batch, seq, state_size = 2, 8, 8
    action_size, lstm_hidden, fc_units = 2, 64, 128

    params = init_params(k_param, state_size, action_size, lstm_hidden, fc_units)
    prep = prepare_params(params)       # one-time, outside the hot path
    state = jax.random.normal(k_state, (batch, seq, state_size), jnp.float32)

    out = qnetwork_forward(state, prep)
    jax.block_until_ready(out)
    assert out.shape == (batch, action_size)
    print("KERNEL_OK")
</pallas_src>

<mosaic_0001>
module attributes {stable_mosaic.version = 11 : i64} {
  func.func @qnetwork_kernel(%arg0: memref<2x8x8xbf16, #tpu.memory_space<vmem>>, %arg1: memref<8x256xbf16, #tpu.memory_space<vmem>>, %arg2: memref<64x256xbf16, #tpu.memory_space<vmem>>, %arg3: memref<1x256xf32, #tpu.memory_space<vmem>>, %arg4: memref<64x128xbf16, #tpu.memory_space<vmem>>, %arg5: memref<1x128xf32, #tpu.memory_space<vmem>>, %arg6: memref<128x2xbf16, #tpu.memory_space<vmem>>, %arg7: memref<1x2xf32, #tpu.memory_space<vmem>>, %arg8: memref<2x2xf32, #tpu.memory_space<vmem>>) attributes {dimension_semantics = [], scalar_prefetch = 0 : i64, scratch_operands = 0 : i64, tpu.core_type = #tpu.core_type<tc>} {
    %c0 = arith.constant 0 : index
    %c0_0 = arith.constant 0 : index
    %c0_1 = arith.constant 0 : index
    %0 = vector.load %arg0[%c0, %c0_0, %c0_1] : memref<2x8x8xbf16, #tpu.memory_space<vmem>>, vector<2x8x8xbf16>
    %c0_2 = arith.constant 0 : index
    %c0_3 = arith.constant 0 : index
    %1 = vector.load %arg1[%c0_2, %c0_3] : memref<8x256xbf16, #tpu.memory_space<vmem>>, vector<8x256xbf16>
    %c0_4 = arith.constant 0 : index
    %c0_5 = arith.constant 0 : index
    %2 = vector.load %arg2[%c0_4, %c0_5] : memref<64x256xbf16, #tpu.memory_space<vmem>>, vector<64x256xbf16>
    %c0_6 = arith.constant 0 : index
    %c0_7 = arith.constant 0 : index
    %3 = vector.load %arg3[%c0_6, %c0_7] : memref<1x256xf32, #tpu.memory_space<vmem>>, vector<1x256xf32>
    "tpu.trace_start"() <{level = 10 : i32, message = "bts,sg->btg"}> : () -> ()
    %cst = arith.constant dense<0.000000e+00> : vector<2x8x256xf32>
    %4 = tpu.matmul %0, %1, %cst {dimension_numbers = #tpu.dot_dimension_numbers<[2], [0], [0, 1], [1], [0, 0, 0, 1, 1, 1], [], []>} : vector<2x8x8xbf16>, vector<8x256xbf16>, vector<2x8x256xf32> -> vector<2x8x256xf32>
    "tpu.trace_stop"() : () -> ()
    %5 = vector.shape_cast %3 : vector<1x256xf32> to vector<1x1x256xf32>
    %6 = vector.broadcast %5 : vector<1x1x256xf32> to vector<2x8x256xf32>
    %7 = arith.addf %4, %6 : vector<2x8x256xf32>
    %cst_8 = arith.constant 0.000000e+00 : f32
    %8 = vector.broadcast %cst_8 : f32 to vector<2x64xf32>
    %cst_9 = arith.constant 0.000000e+00 : f32
    %9 = vector.broadcast %cst_9 : f32 to vector<2x64xf32>
    %10 = vector.extract_strided_slice %7 {offsets = [0, 0, 0], sizes = [2, 1, 256], strides = [1, 1, 1]} : vector<2x8x256xf32> to vector<2x1x256xf32>
    %11 = vector.shape_cast %10 : vector<2x1x256xf32> to vector<2x256xf32>
    %12 = arith.truncf %8 : vector<2x64xf32> to vector<2x64xbf16>
    %cst_10 = arith.constant dense<0.000000e+00> : vector<2x256xf32>
    %13 = tpu.matmul %12, %2, %cst_10 {dimension_numbers = #tpu.dot_dimension_numbers<[1], [0], [0], [1], [0, 0, 1, 1], [], []>} : vector<2x64xbf16>, vector<64x256xbf16>, vector<2x256xf32> -> vector<2x256xf32>
    %14 = arith.addf %11, %13 : vector<2x256xf32>
    %15 = arith.negf %14 : vector<2x256xf32>
    %16 = math.exp %15 : vector<2x256xf32>
    %cst_11 = arith.constant 1.000000e+00 : f32
    %17 = vector.broadcast %cst_11 : f32 to vector<2x256xf32>
    %18 = arith.addf %17, %16 : vector<2x256xf32>
    %19 = arith.divf %17, %18 : vector<2x256xf32>
    %20 = math.tanh %14 : vector<2x256xf32>
    %21 = vector.extract_strided_slice %19 {offsets = [0, 0], sizes = [2, 64], strides = [1, 1]} : vector<2x256xf32> to vector<2x64xf32>
    %22 = vector.extract_strided_slice %19 {offsets = [0, 64], sizes = [2, 64], strides = [1, 1]} : vector<2x256xf32> to vector<2x64xf32>
    %23 = vector.extract_strided_slice %20 {offsets = [0, 128], sizes = [2, 64], strides = [1, 1]} : vector<2x256xf32> to vector<2x64xf32>
    %24 = vector.extract_strided_slice %19 {offsets = [0, 192], sizes = [2, 64], strides = [1, 1]} : vector<2x256xf32> to vector<2x64xf32>
    %25 = arith.mulf %22, %9 : vector<2x64xf32>
    %26 = arith.mulf %21, %23 : vector<2x64xf32>
    %27 = arith.addf %25, %26 : vector<2x64xf32>
    %28 = math.tanh %27 : vector<2x64xf32>
    %29 = arith.mulf %24, %28 : vector<2x64xf32>
    %30 = vector.extract_strided_slice %7 {offsets = [0, 1, 0], sizes = [2, 1, 256], strides = [1, 1, 1]} : vector<2x8x256xf32> to vector<2x1x256xf32>
    %31 = vector.shape_cast %30 : vector<2x1x256xf32> to vector<2x256xf32>
    %32 = arith.truncf %29 : vector<2x64xf32> to vector<2x64xbf16>
    %cst_12 = arith.constant dense<0.000000e+00> : vector<2x256xf32>
    %33 = tpu.matmul %32, %2, %cst_12 {dimension_numbers = #tpu.dot_dimension_numbers<[1], [0], [0], [1], [0, 0, 1, 1], [], []>} : vector<2x64xbf16>, vector<64x256xbf16>, vector<2x256xf32> -> vector<2x256xf32>
    %34 = arith.addf %31, %33 : vector<2x256xf32>
    %35 = arith.negf %34 : vector<2x256xf32>
    %36 = math.exp %35 : vector<2x256xf32>
    %cst_13 = arith.constant 1.000000e+00 : f32
    %37 = vector.broadcast %cst_13 : f32 to vector<2x256xf32>
    %38 = arith.addf %37, %36 : vector<2x256xf32>
    %39 = arith.divf %37, %38 : vector<2x256xf32>
    %40 = math.tanh %34 : vector<2x256xf32>
    %41 = vector.extract_strided_slice %39 {offsets = [0, 0], sizes = [2, 64], strides = [1, 1]} : vector<2x256xf32> to vector<2x64xf32>
    %42 = vector.extract_strided_slice %39 {offsets = [0, 64], sizes = [2, 64], strides = [1, 1]} : vector<2x256xf32> to vector<2x64xf32>
    %43 = vector.extract_strided_slice %40 {offsets = [0, 128], sizes = [2, 64], strides = [1, 1]} : vector<2x256xf32> to vector<2x64xf32>
    %44 = vector.extract_strided_slice %39 {offsets = [0, 192], sizes = [2, 64], strides = [1, 1]} : vector<2x256xf32> to vector<2x64xf32>
    %45 = arith.mulf %42, %27 : vector<2x64xf32>
    %46 = arith.mulf %41, %43 : vector<2x64xf32>
    %47 = arith.addf %45, %46 : vector<2x64xf32>
    %48 = math.tanh %47 : vector<2x64xf32>
    %49 = arith.mulf %44, %48 : vector<2x64xf32>
    %50 = vector.extract_strided_slice %7 {offsets = [0, 2, 0], sizes = [2, 1, 256], strides = [1, 1, 1]} : vector<2x8x256xf32> to vector<2x1x256xf32>
    %51 = vector.shape_cast %50 : vector<2x1x256xf32> to vector<2x256xf32>
    %52 = arith.truncf %49 : vector<2x64xf32> to vector<2x64xbf16>
    %cst_14 = arith.constant dense<0.000000e+00> : vector<2x256xf32>
    %53 = tpu.matmul %52, %2, %cst_14 {dimension_numbers = #tpu.dot_dimension_numbers<[1], [0], [0], [1], [0, 0, 1, 1], [], []>} : vector<2x64xbf16>, vector<64x256xbf16>, vector<2x256xf32> -> vector<2x256xf32>
    %54 = arith.addf %51, %53 : vector<2x256xf32>
    %55 = arith.negf %54 : vector<2x256xf32>
    %56 = math.exp %55 : vector<2x256xf32>
    %cst_15 = arith.constant 1.000000e+00 : f32
    %57 = vector.broadcast %cst_15 : f32 to vector<2x256xf32>
    %58 = arith.addf %57, %56 : vector<2x256xf32>
    %59 = arith.divf %57, %58 : vector<2x256xf32>
    %60 = math.tanh %54 : vector<2x256xf32>
    %61 = vector.extract_strided_slice %59 {offsets = [0, 0], sizes = [2, 64], strides = [1, 1]} : vector<2x256xf32> to vector<2x64xf32>
    %62 = vector.extract_strided_slice %59 {offsets = [0, 64], sizes = [2, 64], strides = [1, 1]} : vector<2x256xf32> to vector<2x64xf32>
    %63 = vector.extract_strided_slice %60 {offsets = [0, 128], sizes = [2, 64], strides = [1, 1]} : vector<2x256xf32> to vector<2x64xf32>
    %64 = vector.extract_strided_slice %59 {offsets = [0, 192], sizes = [2, 64], strides = [1, 1]} : vector<2x256xf32> to vector<2x64xf32>
    %65 = arith.mulf %62, %47 : vector<2x64xf32>
    %66 = arith.mulf %61, %63 : vector<2x64xf32>
    %67 = arith.addf %65, %66 : vector<2x64xf32>
    %68 = math.tanh %67 : vector<2x64xf32>
    %69 = arith.mulf %64, %68 : vector<2x64xf32>
    %70 = vector.extract_strided_slice %7 {offsets = [0, 3, 0], sizes = [2, 1, 256], strides = [1, 1, 1]} : vector<2x8x256xf32> to vector<2x1x256xf32>
    %71 = vector.shape_cast %70 : vector<2x1x256xf32> to vector<2x256xf32>
    %72 = arith.truncf %69 : vector<2x64xf32> to vector<2x64xbf16>
    %cst_16 = arith.constant dense<0.000000e+00> : vector<2x256xf32>
    %73 = tpu.matmul %72, %2, %cst_16 {dimension_numbers = #tpu.dot_dimension_numbers<[1], [0], [0], [1], [0, 0, 1, 1], [], []>} : vector<2x64xbf16>, vector<64x256xbf16>, vector<2x256xf32> -> vector<2x256xf32>
    %74 = arith.addf %71, %73 : vector<2x256xf32>
    %75 = arith.negf %74 : vector<2x256xf32>
    %76 = math.exp %75 : vector<2x256xf32>
    %cst_17 = arith.constant 1.000000e+00 : f32
    %77 = vector.broadcast %cst_17 : f32 to vector<2x256xf32>
    %78 = arith.addf %77, %76 : vector<2x256xf32>
    %79 = arith.divf %77, %78 : vector<2x256xf32>
    %80 = math.tanh %74 : vector<2x256xf32>
    %81 = vector.extract_strided_slice %79 {offsets = [0, 0], sizes = [2, 64], strides = [1, 1]} : vector<2x256xf32> to vector<2x64xf32>
    %82 = vector.extract_strided_slice %79 {offsets = [0, 64], sizes = [2, 64], strides = [1, 1]} : vector<2x256xf32> to vector<2x64xf32>
    %83 = vector.extract_strided_slice %80 {offsets = [0, 128], sizes = [2, 64], strides = [1, 1]} : vector<2x256xf32> to vector<2x64xf32>
    %84 = vector.extract_strided_slice %79 {offsets = [0, 192], sizes = [2, 64], strides = [1, 1]} : vector<2x256xf32> to vector<2x64xf32>
    %85 = arith.mulf %82, %67 : vector<2x64xf32>
    %86 = arith.mulf %81, %83 : vector<2x64xf32>
    %87 = arith.addf %85, %86 : vector<2x64xf32>
    %88 = math.tanh %87 : vector<2x64xf32>
    %89 = arith.mulf %84, %88 : vector<2x64xf32>
    %90 = vector.extract_strided_slice %7 {offsets = [0, 4, 0], sizes = [2, 1, 256], strides = [1, 1, 1]} : vector<2x8x256xf32> to vector<2x1x256xf32>
    %91 = vector.shape_cast %90 : vector<2x1x256xf32> to vector<2x256xf32>
    %92 = arith.truncf %89 : vector<2x64xf32> to vector<2x64xbf16>
    %cst_18 = arith.constant dense<0.000000e+00> : vector<2x256xf32>
    %93 = tpu.matmul %92, %2, %cst_18 {dimension_numbers = #tpu.dot_dimension_numbers<[1], [0], [0], [1], [0, 0, 1, 1], [], []>} : vector<2x64xbf16>, vector<64x256xbf16>, vector<2x256xf32> -> vector<2x256xf32>
    %94 = arith.addf %91, %93 : vector<2x256xf32>
    %95 = arith.negf %94 : vector<2x256xf32>
    %96 = math.exp %95 : vector<2x256xf32>
    %cst_19 = arith.constant 1.000000e+00 : f32
    %97 = vector.broadcast %cst_19 : f32 to vector<2x256xf32>
    %98 = arith.addf %97, %96 : vector<2x256xf32>
    %99 = arith.divf %97, %98 : vector<2x256xf32>
    %100 = math.tanh %94 : vector<2x256xf32>
    %101 = vector.extract_strided_slice %99 {offsets = [0, 0], sizes = [2, 64], strides = [1, 1]} : vector<2x256xf32> to vector<2x64xf32>
    %102 = vector.extract_strided_slice %99 {offsets = [0, 64], sizes = [2, 64], strides = [1, 1]} : vector<2x256xf32> to vector<2x64xf32>
    %103 = vector.extract_strided_slice %100 {offsets = [0, 128], sizes = [2, 64], strides = [1, 1]} : vector<2x256xf32> to vector<2x64xf32>
    %104 = vector.extract_strided_slice %99 {offsets = [0, 192], sizes = [2, 64], strides = [1, 1]} : vector<2x256xf32> to vector<2x64xf32>
    %105 = arith.mulf %102, %87 : vector<2x64xf32>
    %106 = arith.mulf %101, %103 : vector<2x64xf32>
    %107 = arith.addf %105, %106 : vector<2x64xf32>
    %108 = math.tanh %107 : vector<2x64xf32>
    %109 = arith.mulf %104, %108 : vector<2x64xf32>
    %110 = vector.extract_strided_slice %7 {offsets = [0, 5, 0], sizes = [2, 1, 256], strides = [1, 1, 1]} : vector<2x8x256xf32> to vector<2x1x256xf32>
    %111 = vector.shape_cast %110 : vector<2x1x256xf32> to vector<2x256xf32>
    %112 = arith.truncf %109 : vector<2x64xf32> to vector<2x64xbf16>
    %cst_20 = arith.constant dense<0.000000e+00> : vector<2x256xf32>
    %113 = tpu.matmul %112, %2, %cst_20 {dimension_numbers = #tpu.dot_dimension_numbers<[1], [0], [0], [1], [0, 0, 1, 1], [], []>} : vector<2x64xbf16>, vector<64x256xbf16>, vector<2x256xf32> -> vector<2x256xf32>
    %114 = arith.addf %111, %113 : vector<2x256xf32>
    %115 = arith.negf %114 : vector<2x256xf32>
    %116 = math.exp %115 : vector<2x256xf32>
    %cst_21 = arith.constant 1.000000e+00 : f32
    %117 = vector.broadcast %cst_21 : f32 to vector<2x256xf32>
    %118 = arith.addf %117, %116 : vector<2x256xf32>
    %119 = arith.divf %117, %118 : vector<2x256xf32>
    %120 = math.tanh %114 : vector<2x256xf32>
    %121 = vector.extract_strided_slice %119 {offsets = [0, 0], sizes = [2, 64], strides = [1, 1]} : vector<2x256xf32> to vector<2x64xf32>
    %122 = vector.extract_strided_slice %119 {offsets = [0, 64], sizes = [2, 64], strides = [1, 1]} : vector<2x256xf32> to vector<2x64xf32>
    %123 = vector.extract_strided_slice %120 {offsets = [0, 128], sizes = [2, 64], strides = [1, 1]} : vector<2x256xf32> to vector<2x64xf32>
    %124 = vector.extract_strided_slice %119 {offsets = [0, 192], sizes = [2, 64], strides = [1, 1]} : vector<2x256xf32> to vector<2x64xf32>
    %125 = arith.mulf %122, %107 : vector<2x64xf32>
    %126 = arith.mulf %121, %123 : vector<2x64xf32>
    %127 = arith.addf %125, %126 : vector<2x64xf32>
    %128 = math.tanh %127 : vector<2x64xf32>
    %129 = arith.mulf %124, %128 : vector<2x64xf32>
    %130 = vector.extract_strided_slice %7 {offsets = [0, 6, 0], sizes = [2, 1, 256], strides = [1, 1, 1]} : vector<2x8x256xf32> to vector<2x1x256xf32>
    %131 = vector.shape_cast %130 : vector<2x1x256xf32> to vector<2x256xf32>
    %132 = arith.truncf %129 : vector<2x64xf32> to vector<2x64xbf16>
    %cst_22 = arith.constant dense<0.000000e+00> : vector<2x256xf32>
    %133 = tpu.matmul %132, %2, %cst_22 {dimension_numbers = #tpu.dot_dimension_numbers<[1], [0], [0], [1], [0, 0, 1, 1], [], []>} : vector<2x64xbf16>, vector<64x256xbf16>, vector<2x256xf32> -> vector<2x256xf32>
    %134 = arith.addf %131, %133 : vector<2x256xf32>
    %135 = arith.negf %134 : vector<2x256xf32>
    %136 = math.exp %135 : vector<2x256xf32>
    %cst_23 = arith.constant 1.000000e+00 : f32
    %137 = vector.broadcast %cst_23 : f32 to vector<2x256xf32>
    %138 = arith.addf %137, %136 : vector<2x256xf32>
    %139 = arith.divf %137, %138 : vector<2x256xf32>
    %140 = math.tanh %134 : vector<2x256xf32>
    %141 = vector.extract_strided_slice %139 {offsets = [0, 0], sizes = [2, 64], strides = [1, 1]} : vector<2x256xf32> to vector<2x64xf32>
    %142 = vector.extract_strided_slice %139 {offsets = [0, 64], sizes = [2, 64], strides = [1, 1]} : vector<2x256xf32> to vector<2x64xf32>
    %143 = vector.extract_strided_slice %140 {offsets = [0, 128], sizes = [2, 64], strides = [1, 1]} : vector<2x256xf32> to vector<2x64xf32>
    %144 = vector.extract_strided_slice %139 {offsets = [0, 192], sizes = [2, 64], strides = [1, 1]} : vector<2x256xf32> to vector<2x64xf32>
    %145 = arith.mulf %142, %127 : vector<2x64xf32>
    %146 = arith.mulf %141, %143 : vector<2x64xf32>
    %147 = arith.addf %145, %146 : vector<2x64xf32>
    %148 = math.tanh %147 : vector<2x64xf32>
    %149 = arith.mulf %144, %148 : vector<2x64xf32>
    %150 = vector.extract_strided_slice %7 {offsets = [0, 7, 0], sizes = [2, 1, 256], strides = [1, 1, 1]} : vector<2x8x256xf32> to vector<2x1x256xf32>
    %151 = vector.shape_cast %150 : vector<2x1x256xf32> to vector<2x256xf32>
    %152 = arith.truncf %149 : vector<2x64xf32> to vector<2x64xbf16>
    %cst_24 = arith.constant dense<0.000000e+00> : vector<2x256xf32>
    %153 = tpu.matmul %152, %2, %cst_24 {dimension_numbers = #tpu.dot_dimension_numbers<[1], [0], [0], [1], [0, 0, 1, 1], [], []>} : vector<2x64xbf16>, vector<64x256xbf16>, vector<2x256xf32> -> vector<2x256xf32>
    %154 = arith.addf %151, %153 : vector<2x256xf32>
    %155 = arith.negf %154 : vector<2x256xf32>
    %156 = math.exp %155 : vector<2x256xf32>
    %cst_25 = arith.constant 1.000000e+00 : f32
    %157 = vector.broadcast %cst_25 : f32 to vector<2x256xf32>
    %158 = arith.addf %157, %156 : vector<2x256xf32>
    %159 = arith.divf %157, %158 : vector<2x256xf32>
    %160 = math.tanh %154 : vector<2x256xf32>
    %161 = vector.extract_strided_slice %159 {offsets = [0, 0], sizes = [2, 64], strides = [1, 1]} : vector<2x256xf32> to vector<2x64xf32>
    %162 = vector.extract_strided_slice %159 {offsets = [0, 64], sizes = [2, 64], strides = [1, 1]} : vector<2x256xf32> to vector<2x64xf32>
    %163 = vector.extract_strided_slice %160 {offsets = [0, 128], sizes = [2, 64], strides = [1, 1]} : vector<2x256xf32> to vector<2x64xf32>
    %164 = vector.extract_strided_slice %159 {offsets = [0, 192], sizes = [2, 64], strides = [1, 1]} : vector<2x256xf32> to vector<2x64xf32>
    %165 = arith.mulf %162, %147 : vector<2x64xf32>
    %166 = arith.mulf %161, %163 : vector<2x64xf32>
    %167 = arith.addf %165, %166 : vector<2x64xf32>
    %168 = math.tanh %167 : vector<2x64xf32>
    %169 = arith.mulf %164, %168 : vector<2x64xf32>
    %170 = arith.truncf %169 : vector<2x64xf32> to vector<2x64xbf16>
    %c0_26 = arith.constant 0 : index
    %c0_27 = arith.constant 0 : index
    %171 = vector.load %arg4[%c0_26, %c0_27] : memref<64x128xbf16, #tpu.memory_space<vmem>>, vector<64x128xbf16>
    %cst_28 = arith.constant dense<0.000000e+00> : vector<2x128xf32>
    %172 = tpu.matmul %170, %171, %cst_28 {dimension_numbers = #tpu.dot_dimension_numbers<[1], [0], [0], [1], [0, 0, 1, 1], [], []>} : vector<2x64xbf16>, vector<64x128xbf16>, vector<2x128xf32> -> vector<2x128xf32>
    %c0_29 = arith.constant 0 : index
    %c0_30 = arith.constant 0 : index
    %173 = vector.load %arg5[%c0_29, %c0_30] : memref<1x128xf32, #tpu.memory_space<vmem>>, vector<1x128xf32>
    %174 = vector.broadcast %173 : vector<1x128xf32> to vector<2x128xf32>
    %175 = arith.addf %172, %174 : vector<2x128xf32>
    %cst_31 = arith.constant 0.000000e+00 : f32
    %176 = vector.broadcast %cst_31 : f32 to vector<2x128xf32>
    %177 = arith.maximumf %175, %176 : vector<2x128xf32>
    %178 = arith.truncf %177 : vector<2x128xf32> to vector<2x128xbf16>
    %c0_32 = arith.constant 0 : index
    %c0_33 = arith.constant 0 : index
    %179 = vector.load %arg6[%c0_32, %c0_33] : memref<128x2xbf16, #tpu.memory_space<vmem>>, vector<128x2xbf16>
    %cst_34 = arith.constant dense<0.000000e+00> : vector<2x2xf32>
    %180 = tpu.matmul %178, %179, %cst_34 {dimension_numbers = #tpu.dot_dimension_numbers<[1], [0], [0], [1], [0, 0, 1, 1], [], []>} : vector<2x128xbf16>, vector<128x2xbf16>, vector<2x2xf32> -> vector<2x2xf32>
    %c0_35 = arith.constant 0 : index
    %c0_36 = arith.constant 0 : index
    %181 = vector.load %arg7[%c0_35, %c0_36] : memref<1x2xf32, #tpu.memory_space<vmem>>, vector<1x2xf32>
    %182 = vector.broadcast %181 : vector<1x2xf32> to vector<2x2xf32>
    %183 = arith.addf %180, %182 : vector<2x2xf32>
    %cst_37 = arith.constant 0.000000e+00 : f32
    %184 = vector.broadcast %cst_37 : f32 to vector<2x2xf32>
    %185 = arith.maximumf %183, %184 : vector<2x2xf32>
    %c0_38 = arith.constant 0 : index
    %c0_39 = arith.constant 0 : index
    %186 = vector.load %arg8[%c0_38, %c0_39] : memref<2x2xf32, #tpu.memory_space<vmem>>, vector<2x2xf32>
    tpu.vector_store %arg8[%c0_38, %c0_39], %185 {strides = array<i32>} : memref<2x2xf32, #tpu.memory_space<vmem>>, vector<2x2xf32>,
    return
  }
}

</mosaic_0001>

<bundles_post_ra>
// kernel: qnetwork_forward.1
= control target key start
LH: loop header
LB: loop body
LE: loop exit
PB: predicated region body
PF: predicated region fallthrough
CT: control target
= control target key end

     0   :  { %vm68_vm0 = vcmask 1043456   ;;  %v1681_v3 = vmov 0   ;;  %vm64_vm1 = vcmask 64512   ;;  %s2022_s0 = inlined_call_operand.vmem [shape: bf16[2,8,8], index: 0, kind: input, shape index: {}]   ;;  %s2023_s1 = inlined_call_operand.vmem [shape: bf16[8,256], index: 1, kind: input, shape index: {}]   ;;  %s2024_s2 = inlined_call_operand.vmem [shape: bf16[64,256], index: 2, kind: input, shape index: {}]   ;;  %s2025_s3 = inlined_call_operand.vmem [shape: f32[1,256], index: 3, kind: input, shape index: {}]   ;;  %s2026_s4 = inlined_call_operand.vmem [shape: bf16[64,128], index: 4, kind: input, shape index: {}]   ;;  %s2027_s5 = inlined_call_operand.vmem [shape: f32[1,128], index: 5, kind: input, shape index: {}]   ;;  %s2028_s6 = inlined_call_operand.vmem [shape: bf16[128,2], index: 6, kind: input, shape index: {}]   ;;  %s2029_s7 = inlined_call_operand.vmem [shape: f32[1,2], index: 7, kind: input, shape index: {}]   ;;  %s2030_s8 = inlined_call_operand.hbm [shape: f32[2,2], index: 8, kind: output, shape index: {}]  }
   0x1   :  { %v33_v0 = vld [vmem:[%s2023_s1] sm:$0xff]  ;;  %107 = vmatprep.mubr.bf16.mxu1 %v1681_v3  ;;  %306 = vmatprep.mubr.bf16.mxu0 %v1681_v3  ;;  %v1752_v8 = vld [vmem:[%s2024_s2 + $0x14] ss:$8 sps:$4 sm:$0xff]   ;;  %v1760_v9 = vld [vmem:[%s2024_s2 + $0x10] ss:$8 sps:$4 sm:$0xff]  }
   0x2   :  { %v1322_v1 = vcombine.high %v33_v0, %v33_v0  ;;  %v1321_v2 = vcombine.low %v33_v0, %v33_v0  ;;  %v1739_v4 = vld [vmem:[%s2024_s2 + $0x4] ss:$8 sps:$4 sm:$0xff]   ;;  %v1747_v7 = vld [vmem:[%s2024_s2] ss:$8 sps:$4 sm:$0xff]   ;;  %v1780_v12 = vld [vmem:[%s2024_s2 + $0x34] ss:$8 sps:$4 sm:$0xff]  }
   0x3   :  { %v1440_v6 = vld [vmem:[%s2022_s0] sm:$0xff]   ;;  %274 = vmatprep.subr.bf16.mxu0 %v1739_v4  ;;  %v1790_v13 = vld [vmem:[%s2024_s2 + $0x30] ss:$8 sps:$4 sm:$0xff]  }
   0x4   :  { %1323 = vmatprep.subr.msk.bf16.mxu1 %vm68_vm0, %v1322_v1  ;;  %v70_v5 = vsel %vm68_vm0, %v1321_v2, 0  ;;  %275 = vmatpush1.bf16.msra.mxu0 %v1747_v7  ;;  %v1765_v10 = vld [vmem:[%s2024_s2 + $0x24] ss:$8 sps:$4 sm:$0xff]   ;;  %v1774_v11 = vld [vmem:[%s2024_s2 + $0x20] ss:$8 sps:$4 sm:$0xff]  }
   0x5   :  { %76 = vmatpush1.bf16.msra.mxu1 %v70_v5  ;;  %276 = vmatprep.subr.bf16.mxu0 %v1752_v8 }
   0x6   :  { %162 = vmatprep.subr.bf16.mxu1 %v1739_v4 }
   0x8   :  { %1324 = vmatmul.mubr.msk.bf16.vlgmr.msra.gmra.mrb[0].mxu1 %vm64_vm1, %v1440_v6  ;;  %277 = vmatpush1.bf16.msra.mxu0 %v1760_v9 }
   0x9   :  { %163 = vmatpush1.bf16.msra.mxu1 %v1747_v7  ;;  %194 = vmatprep.mubr.bf16.mxu1 %v1681_v3 }
   0xa   :  { %164 = vmatprep.subr.bf16.mxu1 %v1752_v8  ;;  %278 = vmatprep.subr.bf16.mxu0 %v1765_v10 }
   0xc   :  { %279 = vmatpush1.bf16.msra.mxu0 %v1774_v11 }
   0xd   :  { %165 = vmatpush1.bf16.msra.mxu1 %v1760_v9  ;;  %280 = vmatprep.subr.bf16.mxu0 %v1780_v12 }
   0xe   :  { %166 = vmatprep.subr.bf16.mxu1 %v1765_v10 }
   0xf   :  { %13 = vsyncpa [#allocation3], 0  ;;  %v44_v14 = vlaneseq  ;;  %v42_v21 = vld [vmem:[%s2025_s3] sm:$0x3]  ;;  %s1682_s3 = smov 64   ;;  %vm266_vm2 = vcmask 1041409  }
  0x10   :  { %281 = vmatpush1.bf16.msra.mxu0 %v1790_v13  ;;  %vm158_vm3 = vcmask 523264   ;;  %vm1684_vm4 = vmmov 0   ;;  %s1685_s25 = smov [#allocation2]   ;;  %vm1304_vm5 = vcmask 9216  }
  0x11   :  { %167 = vmatpush1.bf16.msra.mxu1 %v1774_v11  ;;  %511 = vmatprep.subr.bf16.mxu0 %v1739_v4  ;;  %v45_v18 = vshrl.u32 %v44_v14, 7 }
  0x12   :  { %168 = vmatprep.subr.bf16.mxu1 %v1780_v12 }
  0x13   :  { %v46_v20 = vsub.s32 0, %v45_v18  ;;  %v50_v30 = vsub.s32 1, %v45_v18 }
  0x15   :  { %169 = vmatpush1.bf16.msra.mxu1 %v1790_v13  ;;  %v47_v22 = vrot.slane %v42_v21, %v46_v20  ;;  %v51_v35 = vrot.slane %v42_v21, %v50_v30 }
  0x16   :  { %391 = vmatprep.subr.bf16.mxu1 %v1739_v4 }
  0x18   :  { %195 = vmatmul.mubr.bf16.vlgmr.msra.gmra.mrb[4].mxu1 %v1681_v3 }
  0x19   :  { %392 = vmatpush1.bf16.msra.mxu1 %v1747_v7  ;;  %423 = vmatprep.mubr.bf16.mxu1 %v1681_v3 }
  0x1a   :  { %393 = vmatprep.subr.bf16.mxu1 %v1752_v8 }
  0x1d   :  { %394 = vmatpush1.bf16.msra.mxu1 %v1760_v9 }
  0x1e   :  { %395 = vmatprep.subr.bf16.mxu1 %v1765_v10 }
  0x21   :  { %396 = vmatpush1.bf16.msra.mxu1 %v1774_v11 }
  0x22   :  { %397 = vmatprep.subr.bf16.mxu1 %v1780_v12 }
  0x25   :  { %398 = vmatpush1.bf16.msra.mxu1 %v1790_v13 }
  0x26   :  { %631 = vmatprep.subr.bf16.mxu1 %v1739_v4 }
  0xdb   :  { %v109_v15 = vpop.f32.mrb[0].mxu1 }
  0xdc   :  { %v111_v16 = vpop.f32.mrb[1].mxu1  ;;  %v1811_v23 = vadd.f32 %v109_v15, %v47_v22 }
  0xdd   :  { %v113_v17 = vpop.f32.mrb[2].mxu1  ;;  %v1817_v36 = vadd.f32 %v111_v16, %v51_v35 }
  0xde   :  { %v115_v19 = vpop.f32.mrb[3].mxu1  ;;  %v1813_v25 = vadd.f32 %v113_v17, %v47_v22 }
  0xdf   :  { %v1819_v38 = vadd.f32 %v115_v19, %v51_v35 }
  0xeb   :  { %v196_v24 = vpop.f32.mrb[4].mxu1 }
  0xec   :  { %v205_v26 = vrot.slane %v196_v24, 1  ;;  %v211_v27 = vadd.f32 %v196_v24, %v1811_v23  ;;  %v198_v28 = vpop.f32.mrb[5].mxu1 }
  0xed   :  { %v200_v29 = vpop.f32.mrb[6].mxu1  ;;  %v206_v37 = vrot.slane %v198_v28, 1  ;;  %v212_v39 = vadd.f32 %v198_v28, %v1817_v36 }
  0xee   :  { %v213_v31 = vadd.f32 %v205_v26, %v1813_v25  ;;  %v1333_v32 = vmul.f32 -1.442695, %v211_v27  ;;  %v201_v33 = vpop.f32.mrb[7].mxu1 }
  0xef   :  { %v214_v41 = vadd.f32 %v206_v37, %v1819_v38  ;;  %v1334_v52 = vmul.f32 -1.442695, %v212_v39 }
  0xf0   :  { %1465 = vpow2.f32 %v1333_v32  ;;  %v1335_v34 = vmul.f32 -1.442695, %v213_v31 }
  0xf1   :  { %v1336_v51 = vmul.f32 -1.442695, %v214_v41 }
  0xf2   :  { %1467 = vpow2.f32 %v1335_v34 }
  0xf3   :  { %1469 = vtanh.f32 %v212_v39 }
  0xfa   :  { %v1466_v40 = vpop.eup %1465 }
  0xfb   :  { %v227_v42 = vadd.f32 1.0, %v1466_v40 }
  0xfc   :  { %v1468_v43 = vpop.eup %1467 }
  0xfd   :  { %v229_v44 = vadd.f32 1.0, %v1468_v43  ;;  %1471 = vrcp.f32 %v227_v42  ;;  %v1470_v45 = vpop.eup %1469 }
  0xfe   :  { %1473 = vtanh.f32 %v214_v41 }
  0xff   :  { %1475 = vrcp.f32 %v229_v44 }
 0x100   :  { %1477 = vpow2.f32 %v1336_v51 }
 0x101   :  { %1479 = vpow2.f32 %v1334_v52 }
 0x107   :  { %v1472_v46 = vpop.eup %1471 }
 0x108   :  { %v1474_v47 = vpop.eup %1473  ;;  %v243_v48 = vmul.f32 %v1472_v46, %v1470_v45  ;;  %v241_v60 = vmul.f32 0.0, %v1472_v46 }
 0x109   :  { %v1476_v49 = vpop.eup %1475 }
 0x10a   :  { %v244_v50 = vmul.f32 %v1476_v49, %v1474_v47  ;;  %v1478_v53 = vpop.eup %1477  ;;  %v242_v56 = vmul.f32 0.0, %v1476_v49 }
 0x10b   :  { %v230_v54 = vadd.f32 1.0, %v1478_v53  ;;  %v1480_v55 = vpop.eup %1479 }
 0x10c   :  { %249 = vrot.lane.b32.xlu0 %v244_v50, %s1682_s3  ;;  %v228_v59 = vadd.f32 1.0, %v1480_v55 }
 0x10d   :  { %1481 = vrcp.f32 %v230_v54 }
 0x110   :  { %247 = vrot.lane.b32.xlu0 %v243_v48, %s1682_s3 }
 0x117   :  { %v1482_v63 = vpop.eup %1481 }
 0x17e   :  { %v250_v57 = vpop.permute.xlu0 %249 }
 0x17f   :  { %v1825_v58 = vadd.f32 %v250_v57, %v242_v56 }
 0x181   :  { %1483 = vtanh.f32 %v1825_v58  ;;  %v356_v43 = vrot.slane %v1825_v58, 7 }
 0x182   :  { %v248_v61 = vpop.permute.xlu0 %247  ;;  %1485 = vrcp.f32 %v228_v59 }
 0x183   :  { %v1828_v62 = vadd.f32 %v248_v61, %v241_v60 }
 0x185   :  { %1487 = vtanh.f32 %v1828_v62  ;;  %v355_v46 = vrot.slane %v1828_v62, 7 }
 0x18b   :  { %v1484_v0 = vpop.eup %1483 }
 0x18c   :  { %v258_v1 = vmul.f32 %v1484_v0, %v1482_v63  ;;  %v1486_v2 = vpop.eup %1485 }
 0x18e   :  { %v260_v5 = vpack.c.bf16 %v258_v1, %v258_v1 }
 0x18f   :  { %v1488_v6 = vpop.eup %1487 }
 0x190   :  { %v257_v14 = vmul.f32 %v1488_v6, %v1486_v2  ;;  %v264_v15 = vunpack.c.l.b16 %v260_v5 }
 0x192   :  { %v259_v16 = vpack.c.bf16 %v257_v14, %v257_v14  ;;  %v265_v18 = vrot.slane %v264_v15, 7 }
 0x194   :  { %v263_v17 = vunpack.c.l.b16 %v259_v16 }
 0x196   :  { %v267_v19 = vsel %vm266_vm2, %v265_v18, %v263_v17 }
 0x197   :  { %v268_v20 = vpack.c.b16 %v267_v19, %v267_v19 }
 0x199   :  { %269 = vrot.lane.b32.xlu1 %v268_v20, %s1682_s3 }
 0x20b   :  { %v270_v21 = vpop.permute.xlu1 %269 }
 0x20c   :  { %1337 = vmatmul.mubr.msk.bf16.vlgmr.msra.gmra.mrb[0].mxu0 %vm158_vm3, %v270_v21 }
 0x20d   :  { %512 = vmatpush1.bf16.msra.mxu0 %v1747_v7  ;;  %543 = vmatprep.mubr.bf16.mxu0 %v1681_v3 }
 0x20e   :  { %513 = vmatprep.subr.bf16.mxu0 %v1752_v8 }
 0x211   :  { %514 = vmatpush1.bf16.msra.mxu0 %v1760_v9 }
 0x212   :  { %515 = vmatprep.subr.bf16.mxu0 %v1765_v10 }
 0x215   :  { %516 = vmatpush1.bf16.msra.mxu0 %v1774_v11 }
 0x216   :  { %517 = vmatprep.subr.bf16.mxu0 %v1780_v12 }
 0x219   :  { %518 = vmatpush1.bf16.msra.mxu0 %v1790_v13 }
 0x21a   :  { %751 = vmatprep.subr.bf16.mxu0 %v1739_v4 }
 0x2df   :  { %v308_v22 = vpop.f32.mrb[0].mxu0 }
 0x2e0   :  { %v317_v24 = vrot.slane %v308_v22, 7  ;;  %v325_v26 = vadd.f32 %v308_v22, %v1813_v25  ;;  %v310_v27 = vpop.f32.mrb[1].mxu0 }
 0x2e1   :  { %v312_v28 = vpop.f32.mrb[2].mxu0  ;;  %v318_v33 = vrot.slane %v310_v27, 7  ;;  %v326_v34 = vadd.f32 %v310_v27, %v1819_v38 }
 0x2e2   :  { %v323_v29 = vadd.f32 %v317_v24, %v1811_v23  ;;  %v1340_v30 = vmul.f32 -1.442695, %v325_v26  ;;  %v313_v31 = vpop.f32.mrb[3].mxu0 }
 0x2e3   :  { %v324_v37 = vadd.f32 %v318_v33, %v1817_v36  ;;  %v1341_v52 = vmul.f32 -1.442695, %v326_v34 }
 0x2e4   :  { %v1338_v32 = vmul.f32 -1.442695, %v323_v29  ;;  %1489 = vpow2.f32 %v1340_v30 }
 0x2e5   :  { %v1339_v53 = vmul.f32 -1.442695, %v324_v37 }
 0x2e6   :  { %1491 = vpow2.f32 %v1338_v32 }
 0x2e7   :  { %1493 = vtanh.f32 %v326_v34 }
 0x2ee   :  { %v1490_v35 = vpop.eup %1489 }
 0x2ef   :  { %v341_v39 = vadd.f32 1.0, %v1490_v35 }
 0x2f0   :  { %v1492_v40 = vpop.eup %1491 }
 0x2f1   :  { %v339_v41 = vadd.f32 1.0, %v1492_v40  ;;  %1495 = vrcp.f32 %v341_v39  ;;  %v1494_v42 = vpop.eup %1493 }
 0x2f2   :  { %1497 = vtanh.f32 %v324_v37 }
 0x2f3   :  { %1499 = vrcp.f32 %v339_v41 }
 0x2f4   :  { %1501 = vpow2.f32 %v1341_v52 }
 0x2f5   :  { %1503 = vpow2.f32 %v1339_v53 }
 0x2fb   :  { %v1496_v44 = vpop.eup %1495 }
 0x2fc   :  { %v1498_v45 = vpop.eup %1497  ;;  %v362_v47 = vmul.f32 %v1496_v44, %v1494_v42  ;;  %v360_v48 = vmul.f32 %v1496_v44, %v356_v43 }
 0x2fd   :  { %v1500_v49 = vpop.eup %1499 }
 0x2fe   :  { %367 = vrot.lane.b32.xlu0 %v362_v47, %s1682_s3  ;;  %v361_v50 = vmul.f32 %v1500_v49, %v1498_v45  ;;  %v359_v51 = vmul.f32 %v1500_v49, %v355_v46  ;;  %v1502_v54 = vpop.eup %1501 }
 0x2ff   :  { %v1504_v55 = vpop.eup %1503  ;;  %v342_v56 = vadd.f32 1.0, %v1502_v54 }
 0x300   :  { %365 = vrot.lane.b32.xlu1 %v361_v50, %s1682_s3  ;;  %v340_v57 = vadd.f32 1.0, %v1504_v55 }
 0x301   :  { %1505 = vrcp.f32 %v342_v56 }
 0x30b   :  { %v1506_v62 = vpop.eup %1505 }
 0x370   :  { %v368_v58 = vpop.permute.xlu0 %367 }
 0x371   :  { %v1851_v59 = vadd.f32 %v368_v58, %v360_v48 }
 0x372   :  { %v366_v60 = vpop.permute.xlu1 %365 }
 0x373   :  { %1507 = vtanh.f32 %v1851_v59  ;;  %v371_v61 = vadd.f32 %v366_v60, %v359_v51  ;;  %v475_v47 = vrot.slane %v1851_v59, 7 }
 0x374   :  { %1509 = vrcp.f32 %v340_v57 }
 0x375   :  { %1511 = vtanh.f32 %v371_v61  ;;  %v474_v45 = vrot.slane %v371_v61, 7 }
 0x37d   :  { %v1508_v63 = vpop.eup %1507 }
 0x37e   :  { %v1510_v0 = vpop.eup %1509  ;;  %v376_v1 = vmul.f32 %v1508_v63, %v1506_v62 }
 0x37f   :  { %v1512_v2 = vpop.eup %1511 }
 0x380   :  { %v375_v5 = vmul.f32 %v1512_v2, %v1510_v0  ;;  %v378_v14 = vpack.c.bf16 %v376_v1, %v376_v1 }
 0x382   :  { %v377_v6 = vpack.c.bf16 %v375_v5, %v375_v5  ;;  %v382_v16 = vunpack.c.l.b16 %v378_v14 }
 0x384   :  { %v381_v15 = vunpack.c.l.b16 %v377_v6 }
 0x386   :  { %v383_v17 = vrot.slane %v381_v15, 1 }
 0x388   :  { %v384_v18 = vsel %vm266_vm2, %v382_v16, %v383_v17 }
 0x389   :  { %v385_v19 = vpack.c.b16 %v384_v18, %v384_v18 }
 0x38b   :  { %386 = vrot.lane.b32.xlu1 %v385_v19, %s1682_s3 }
 0x3fd   :  { %v387_v20 = vpop.permute.xlu1 %386 }
 0x3fe   :  { %1342 = vmatmul.mubr.msk.bf16.vlgmr.msra.gmra.mrb[8].mxu1 %vm158_vm3, %v387_v20 }
 0x3ff   :  { %632 = vmatpush1.bf16.msra.mxu1 %v1747_v7  ;;  %663 = vmatprep.mubr.bf16.mxu1 %v1681_v3 }
 0x400   :  { %633 = vmatprep.subr.bf16.mxu1 %v1752_v8 }
 0x403   :  { %634 = vmatpush1.bf16.msra.mxu1 %v1760_v9 }
 0x404   :  { %635 = vmatprep.subr.bf16.mxu1 %v1765_v10 }
 0x407   :  { %636 = vmatpush1.bf16.msra.mxu1 %v1774_v11 }
 0x408   :  { %637 = vmatprep.subr.bf16.mxu1 %v1780_v12 }
 0x40b   :  { %638 = vmatpush1.bf16.msra.mxu1 %v1790_v13 }
 0x40c   :  { %871 = vmatprep.subr.bf16.mxu1 %v1739_v4 }
 0x4d1   :  { %v425_v21 = vpop.f32.mrb[8].mxu1 }
 0x4d2   :  { %v434_v22 = vrot.slane %v425_v21, 6  ;;  %v436_v24 = vrot.slane %v425_v21, 7  ;;  %v427_v26 = vpop.f32.mrb[9].mxu1 }
 0x4d3   :  { %v429_v27 = vpop.f32.mrb[10].mxu1  ;;  %v435_v33 = vrot.slane %v427_v26, 6  ;;  %v437_v34 = vrot.slane %v427_v26, 7 }
 0x4d4   :  { %v442_v28 = vadd.f32 %v434_v22, %v1811_v23  ;;  %v444_v29 = vadd.f32 %v436_v24, %v1813_v25  ;;  %v430_v30 = vpop.f32.mrb[11].mxu1 }
 0x4d5   :  { %v443_v35 = vadd.f32 %v435_v33, %v1817_v36  ;;  %v445_v37 = vadd.f32 %v437_v34, %v1819_v38 }
 0x4d6   :  { %v1343_v31 = vmul.f32 -1.442695, %v442_v28  ;;  %v1345_v32 = vmul.f32 -1.442695, %v444_v29 }
 0x4d7   :  { %v1344_v53 = vmul.f32 -1.442695, %v443_v35  ;;  %v1346_v54 = vmul.f32 -1.442695, %v445_v37 }
 0x4d8   :  { %1513 = vpow2.f32 %v1343_v31 }
 0x4d9   :  { %1515 = vpow2.f32 %v1345_v32 }
 0x4da   :  { %1517 = vtanh.f32 %v443_v35 }
 0x4db   :  { %1519 = vtanh.f32 %v445_v37 }
 0x4e2   :  { %v1514_v39 = vpop.eup %1513 }
 0x4e3   :  { %v1516_v40 = vpop.eup %1515  ;;  %v458_v41 = vadd.f32 1.0, %v1514_v39 }
 0x4e4   :  { %v460_v42 = vadd.f32 1.0, %v1516_v40  ;;  %v1518_v43 = vpop.eup %1517 }
 0x4e5   :  { %1521 = vrcp.f32 %v458_v41  ;;  %v1520_v44 = vpop.eup %1519 }
 0x4e6   :  { %1523 = vrcp.f32 %v460_v42 }
 0x4e7   :  { %1525 = vpow2.f32 %v1344_v53 }
 0x4e8   :  { %1527 = vpow2.f32 %v1346_v54 }
 0x4ef   :  { %v1522_v46 = vpop.eup %1521 }
 0x4f0   :  { %v1524_v48 = vpop.eup %1523  ;;  %v480_v49 = vmul.f32 %v1522_v46, %v1518_v43  ;;  %v478_v50 = vmul.f32 %v1522_v46, %v474_v45 }
 0x4f1   :  { %v481_v51 = vmul.f32 %v1524_v48, %v1520_v44  ;;  %v479_v52 = vmul.f32 %v1524_v48, %v475_v47  ;;  %v1526_v55 = vpop.eup %1525 }
 0x4f2   :  { %484 = vrot.lane.b32.xlu0 %v480_v49, %s1682_s3  ;;  %v1528_v56 = vpop.eup %1527  ;;  %v459_v57 = vadd.f32 1.0, %v1526_v55 }
 0x4f3   :  { %486 = vrot.lane.b32.xlu1 %v481_v51, %s1682_s3  ;;  %v461_v58 = vadd.f32 1.0, %v1528_v56 }
 0x4f4   :  { %1529 = vrcp.f32 %v459_v57 }
 0x4f5   :  { %1531 = vrcp.f32 %v461_v58 }
 0x4fe   :  { %v1530_v63 = vpop.eup %1529 }
 0x4ff   :  { %v1532_v0 = vpop.eup %1531 }
 0x564   :  { %v485_v60 = vpop.permute.xlu0 %484 }
 0x565   :  { %v487_v59 = vpop.permute.xlu1 %486  ;;  %v1873_v61 = vadd.f32 %v485_v60, %v478_v50 }
 0x566   :  { %v1875_v62 = vadd.f32 %v487_v59, %v479_v52 }
 0x567   :  { %1533 = vtanh.f32 %v1873_v61  ;;  %v594_v46 = vrot.slane %v1873_v61, 7 }
 0x568   :  { %1535 = vtanh.f32 %v1875_v62  ;;  %v595_v48 = vrot.slane %v1875_v62, 7 }
 0x571   :  { %v1534_v1 = vpop.eup %1533 }
 0x572   :  { %v1536_v2 = vpop.eup %1535  ;;  %v494_v5 = vmul.f32 %v1534_v1, %v1530_v63 }
 0x573   :  { %v495_v6 = vmul.f32 %v1536_v2, %v1532_v0 }
 0x574   :  { %v496_v14 = vpack.c.bf16 %v494_v5, %v494_v5 }
 0x575   :  { %v497_v15 = vpack.c.bf16 %v495_v6, %v495_v6 }
 0x576   :  { %v500_v16 = vunpack.c.l.b16 %v496_v14 }
 0x577   :  { %v501_v17 = vunpack.c.l.b16 %v497_v15 }
 0x578   :  { %v502_v18 = vrot.slane %v500_v16, 2 }
 0x579   :  { %v503_v19 = vrot.slane %v501_v17, 1 }
 0x57b   :  { %v504_v20 = vsel %vm266_vm2, %v503_v19, %v502_v18 }
 0x57c   :  { %v505_v21 = vpack.c.b16 %v504_v20, %v504_v20 }
 0x57e   :  { %506 = vrot.lane.b32.xlu0 %v505_v21, %s1682_s3 }
 0x5f0   :  { %v507_v22 = vpop.permute.xlu0 %506 }
 0x5f1   :  { %1347 = vmatmul.mubr.msk.bf16.vlgmr.msra.gmra.mrb[4].mxu0 %vm158_vm3, %v507_v22 }
 0x5f2   :  { %752 = vmatpush1.bf16.msra.mxu0 %v1747_v7  ;;  %783 = vmatprep.mubr.bf16.mxu0 %v1681_v3 }
 0x5f3   :  { %753 = vmatprep.subr.bf16.mxu0 %v1752_v8 }
 0x5f6   :  { %754 = vmatpush1.bf16.msra.mxu0 %v1760_v9 }
 0x5f7   :  { %755 = vmatprep.subr.bf16.mxu0 %v1765_v10 }
 0x5fa   :  { %756 = vmatpush1.bf16.msra.mxu0 %v1774_v11 }
 0x5fb   :  { %757 = vmatprep.subr.bf16.mxu0 %v1780_v12 }
 0x5fe   :  { %758 = vmatpush1.bf16.msra.mxu0 %v1790_v13 }
 0x5ff   :  { %991 = vmatprep.subr.bf16.mxu0 %v1739_v4 }
 0x6c4   :  { %v545_v24 = vpop.f32.mrb[4].mxu0 }
 0x6c5   :  { %v554_v26 = vrot.slane %v545_v24, 5  ;;  %v556_v27 = vrot.slane %v545_v24, 6  ;;  %v547_v28 = vpop.f32.mrb[5].mxu0 }
 0x6c6   :  { %v549_v29 = vpop.f32.mrb[6].mxu0  ;;  %v555_v35 = vrot.slane %v547_v28, 5  ;;  %v557_v37 = vrot.slane %v547_v28, 6 }
 0x6c7   :  { %v562_v30 = vadd.f32 %v554_v26, %v1811_v23  ;;  %v564_v31 = vadd.f32 %v556_v27, %v1813_v25  ;;  %v550_v32 = vpop.f32.mrb[7].mxu0 }
 0x6c8   :  { %v563_v39 = vadd.f32 %v555_v35, %v1817_v36  ;;  %v565_v4 = vadd.f32 %v557_v37, %v1819_v38 }
 0x6c9   :  { %v1348_v33 = vmul.f32 -1.442695, %v562_v30  ;;  %v1350_v34 = vmul.f32 -1.442695, %v564_v31 }
 0x6ca   :  { %v1349_v54 = vmul.f32 -1.442695, %v563_v39  ;;  %v1351_v55 = vmul.f32 -1.442695, %v565_v4 }
 0x6cb   :  { %1537 = vpow2.f32 %v1348_v33 }
 0x6cc   :  { %1539 = vpow2.f32 %v1350_v34 }
 0x6cd   :  { %1541 = vtanh.f32 %v563_v39 }
 0x6ce   :  { %1543 = vtanh.f32 %v565_v4 }
 0x6d5   :  { %v1538_v40 = vpop.eup %1537 }
 0x6d6   :  { %v1540_v41 = vpop.eup %1539  ;;  %v578_v42 = vadd.f32 1.0, %v1538_v40 }
 0x6d7   :  { %v580_v43 = vadd.f32 1.0, %v1540_v41  ;;  %v1542_v44 = vpop.eup %1541 }
 0x6d8   :  { %1545 = vrcp.f32 %v578_v42  ;;  %v1544_v45 = vpop.eup %1543 }
 0x6d9   :  { %1547 = vrcp.f32 %v580_v43 }
 0x6da   :  { %1549 = vpow2.f32 %v1349_v54 }
 0x6db   :  { %1551 = vpow2.f32 %v1351_v55 }
 0x6e2   :  { %v1546_v47 = vpop.eup %1545 }
 0x6e3   :  { %v1548_v49 = vpop.eup %1547  ;;  %v600_v50 = vmul.f32 %v1546_v47, %v1542_v44  ;;  %v598_v51 = vmul.f32 %v1546_v47, %v594_v46 }
 0x6e4   :  { %v601_v52 = vmul.f32 %v1548_v49, %v1544_v45  ;;  %v599_v53 = vmul.f32 %v1548_v49, %v595_v48  ;;  %v1550_v56 = vpop.eup %1549 }
 0x6e5   :  { %604 = vrot.lane.b32.xlu1 %v600_v50, %s1682_s3  ;;  %v1552_v57 = vpop.eup %1551  ;;  %v579_v58 = vadd.f32 1.0, %v1550_v56 }
 0x6e6   :  { %606 = vrot.lane.b32.xlu0 %v601_v52, %s1682_s3  ;;  %v581_v60 = vadd.f32 1.0, %v1552_v57 }
 0x6e7   :  { %1553 = vrcp.f32 %v579_v58 }
 0x6e8   :  { %1555 = vrcp.f32 %v581_v60 }
 0x6f1   :  { %v1554_v0 = vpop.eup %1553 }
 0x6f2   :  { %v1556_v1 = vpop.eup %1555 }
 0x757   :  { %v605_v59 = vpop.permute.xlu1 %604 }
 0x758   :  { %v607_v61 = vpop.permute.xlu0 %606  ;;  %v610_v62 = vadd.f32 %v605_v59, %v598_v51 }
 0x759   :  { %v611_v63 = vadd.f32 %v607_v61, %v599_v53 }
 0x75a   :  { %1557 = vtanh.f32 %v610_v62  ;;  %v714_v47 = vrot.slane %v610_v62, 7 }
 0x75b   :  { %1559 = vtanh.f32 %v611_v63  ;;  %v715_v49 = vrot.slane %v611_v63, 7 }
 0x764   :  { %v1558_v2 = vpop.eup %1557 }
 0x765   :  { %v1560_v5 = vpop.eup %1559  ;;  %v614_v6 = vmul.f32 %v1558_v2, %v1554_v0 }
 0x766   :  { %v615_v14 = vmul.f32 %v1560_v5, %v1556_v1 }
 0x767   :  { %v616_v15 = vpack.c.bf16 %v614_v6, %v614_v6 }
 0x768   :  { %v617_v16 = vpack.c.bf16 %v615_v14, %v615_v14 }
 0x769   :  { %v620_v17 = vunpack.c.l.b16 %v616_v15 }
 0x76a   :  { %v621_v18 = vunpack.c.l.b16 %v617_v16 }
 0x76b   :  { %v622_v19 = vrot.slane %v620_v17, 3 }
 0x76c   :  { %v623_v20 = vrot.slane %v621_v18, 2 }
 0x76e   :  { %v624_v21 = vsel %vm266_vm2, %v623_v20, %v622_v19 }
 0x76f   :  { %v625_v22 = vpack.c.b16 %v624_v21, %v624_v21 }
 0x771   :  { %626 = vrot.lane.b32.xlu1 %v625_v22, %s1682_s3 }
 0x7e3   :  { %v627_v24 = vpop.permute.xlu1 %626 }
 0x7e4   :  { %1352 = vmatmul.mubr.msk.bf16.vlgmr.msra.gmra.mrb[12].mxu1 %vm158_vm3, %v627_v24 }
 0x7e5   :  { %872 = vmatpush1.bf16.msra.mxu1 %v1747_v7  ;;  %903 = vmatprep.mubr.bf16.mxu1 %v1681_v3 }
 0x7e6   :  { %873 = vmatprep.subr.bf16.mxu1 %v1752_v8 }
 0x7e9   :  { %874 = vmatpush1.bf16.msra.mxu1 %v1760_v9 }
 0x7ea   :  { %875 = vmatprep.subr.bf16.mxu1 %v1765_v10 }
 0x7ed   :  { %876 = vmatpush1.bf16.msra.mxu1 %v1774_v11 }
 0x7ee   :  { %877 = vmatprep.subr.bf16.mxu1 %v1780_v12 }
 0x7f1   :  { %878 = vmatpush1.bf16.msra.mxu1 %v1790_v13 }
 0x8b7   :  { %v665_v26 = vpop.f32.mrb[12].mxu1 }
 0x8b8   :  { %v674_v27 = vrot.slane %v665_v26, 4  ;;  %v676_v28 = vrot.slane %v665_v26, 5  ;;  %v667_v29 = vpop.f32.mrb[13].mxu1 }
 0x8b9   :  { %v669_v30 = vpop.f32.mrb[14].mxu1  ;;  %v675_v37 = vrot.slane %v667_v29, 4  ;;  %v677_v39 = vrot.slane %v667_v29, 5 }
 0x8ba   :  { %v682_v31 = vadd.f32 %v674_v27, %v1811_v23  ;;  %v684_v32 = vadd.f32 %v676_v28, %v1813_v25  ;;  %v670_v33 = vpop.f32.mrb[15].mxu1 }
 0x8bb   :  { %v683_v4 = vadd.f32 %v675_v37, %v1817_v36  ;;  %v685_v40 = vadd.f32 %v677_v39, %v1819_v38 }
 0x8bc   :  { %v1353_v34 = vmul.f32 -1.442695, %v682_v31  ;;  %v1355_v35 = vmul.f32 -1.442695, %v684_v32 }
 0x8bd   :  { %v1354_v55 = vmul.f32 -1.442695, %v683_v4  ;;  %v1356_v56 = vmul.f32 -1.442695, %v685_v40 }
 0x8be   :  { %1561 = vpow2.f32 %v1353_v34 }
 0x8bf   :  { %1563 = vpow2.f32 %v1355_v35 }
 0x8c0   :  { %1565 = vtanh.f32 %v683_v4 }
 0x8c1   :  { %1567 = vtanh.f32 %v685_v40 }
 0x8c8   :  { %v1562_v41 = vpop.eup %1561 }
 0x8c9   :  { %v1564_v42 = vpop.eup %1563  ;;  %v698_v43 = vadd.f32 1.0, %v1562_v41 }
 0x8ca   :  { %v700_v44 = vadd.f32 1.0, %v1564_v42  ;;  %v1566_v45 = vpop.eup %1565 }
 0x8cb   :  { %1569 = vrcp.f32 %v698_v43  ;;  %v1568_v46 = vpop.eup %1567 }
 0x8cc   :  { %1571 = vrcp.f32 %v700_v44 }
 0x8cd   :  { %1573 = vpow2.f32 %v1354_v55 }
 0x8ce   :  { %1575 = vpow2.f32 %v1356_v56 }
 0x8d5   :  { %v1570_v48 = vpop.eup %1569 }
 0x8d6   :  { %v1572_v50 = vpop.eup %1571  ;;  %v720_v51 = vmul.f32 %v1570_v48, %v1566_v45  ;;  %v718_v52 = vmul.f32 %v1570_v48, %v714_v47 }
 0x8d7   :  { %v721_v53 = vmul.f32 %v1572_v50, %v1568_v46  ;;  %v719_v54 = vmul.f32 %v1572_v50, %v715_v49  ;;  %v1574_v57 = vpop.eup %1573 }
 0x8d8   :  { %724 = vrot.lane.b32.xlu0 %v720_v51, %s1682_s3  ;;  %v1576_v58 = vpop.eup %1575  ;;  %v699_v60 = vadd.f32 1.0, %v1574_v57 }
 0x8d9   :  { %726 = vrot.lane.b32.xlu1 %v721_v53, %s1682_s3  ;;  %v701_v59 = vadd.f32 1.0, %v1576_v58 }
 0x8da   :  { %1577 = vrcp.f32 %v699_v60 }
 0x8db   :  { %1579 = vrcp.f32 %v701_v59 }
 0x8e4   :  { %v1578_v1 = vpop.eup %1577 }
 0x8e5   :  { %v1580_v2 = vpop.eup %1579 }
 0x94a   :  { %v725_v61 = vpop.permute.xlu0 %724 }
 0x94b   :  { %v727_v62 = vpop.permute.xlu1 %726  ;;  %v730_v63 = vadd.f32 %v725_v61, %v718_v52 }
 0x94c   :  { %v731_v0 = vadd.f32 %v727_v62, %v719_v54 }
 0x94d   :  { %1581 = vtanh.f32 %v730_v63  ;;  %v834_v40 = vrot.slane %v730_v63, 7 }
 0x94e   :  { %1583 = vtanh.f32 %v731_v0  ;;  %v835_v42 = vrot.slane %v731_v0, 7 }
 0x957   :  { %v1582_v5 = vpop.eup %1581 }
 0x958   :  { %v1584_v6 = vpop.eup %1583  ;;  %v734_v14 = vmul.f32 %v1582_v5, %v1578_v1 }
 0x959   :  { %v735_v15 = vmul.f32 %v1584_v6, %v1580_v2 }
 0x95a   :  { %v736_v16 = vpack.c.bf16 %v734_v14, %v734_v14 }
 0x95b   :  { %v737_v17 = vpack.c.bf16 %v735_v15, %v735_v15 }
 0x95c   :  { %v740_v18 = vunpack.c.l.b16 %v736_v16 }
 0x95d   :  { %v741_v19 = vunpack.c.l.b16 %v737_v17 }
 0x95e   :  { %v742_v20 = vrot.slane %v740_v18, 4 }
 0x95f   :  { %v743_v21 = vrot.slane %v741_v19, 3 }
 0x961   :  { %v744_v22 = vsel %vm266_vm2, %v743_v21, %v742_v20 }
 0x962   :  { %v745_v24 = vpack.c.b16 %v744_v22, %v744_v22 }
 0x964   :  { %746 = vrot.lane.b32.xlu0 %v745_v24, %s1682_s3 }
 0x9d6   :  { %v747_v26 = vpop.permute.xlu0 %746 }
 0x9d7   :  { %1357 = vmatmul.mubr.msk.bf16.vlgmr.msra.gmra.mrb[8].mxu0 %vm158_vm3, %v747_v26 }
 0x9d8   :  { %992 = vmatpush1.bf16.msra.mxu0 %v1747_v7  ;;  %1023 = vmatprep.mubr.bf16.mxu0 %v1681_v3 }
 0x9d9   :  { %993 = vmatprep.subr.bf16.mxu0 %v1752_v8 }
 0x9dc   :  { %994 = vmatpush1.bf16.msra.mxu0 %v1760_v9 }
 0x9dd   :  { %995 = vmatprep.subr.bf16.mxu0 %v1765_v10 }
 0x9e0   :  { %996 = vmatpush1.bf16.msra.mxu0 %v1774_v11 }
 0x9e1   :  { %997 = vmatprep.subr.bf16.mxu0 %v1780_v12 }
 0x9e4   :  { %998 = vmatpush1.bf16.msra.mxu0 %v1790_v13 }
 0xaaa   :  { %v785_v27 = vpop.f32.mrb[8].mxu0 }
 0xaab   :  { %v794_v28 = vrot.slane %v785_v27, 3  ;;  %v796_v29 = vrot.slane %v785_v27, 4  ;;  %v787_v30 = vpop.f32.mrb[9].mxu0 }
 0xaac   :  { %v789_v31 = vpop.f32.mrb[10].mxu0  ;;  %v795_v10 = vrot.slane %v787_v30, 3  ;;  %v797_v11 = vrot.slane %v787_v30, 4 }
 0xaad   :  { %v802_v7 = vadd.f32 %v794_v28, %v1811_v23  ;;  %v804_v3 = vadd.f32 %v796_v29, %v1813_v25  ;;  %v790_v8 = vpop.f32.mrb[11].mxu0 }
 0xaae   :  { %v803_v12 = vadd.f32 %v795_v10, %v1817_v36  ;;  %v805_v13 = vadd.f32 %v797_v11, %v1819_v38 }
 0xaaf   :  { %v1358_v32 = vmul.f32 -1.442695, %v802_v7  ;;  %v1360_v9 = vmul.f32 -1.442695, %v804_v3 }
 0xab0   :  { %v1359_v48 = vmul.f32 -1.442695, %v803_v12  ;;  %v1361_v49 = vmul.f32 -1.442695, %v805_v13 }
 0xab1   :  { %1585 = vpow2.f32 %v1358_v32 }
 0xab2   :  { %1587 = vpow2.f32 %v1360_v9 }
 0xab3   :  { %1589 = vtanh.f32 %v803_v12 }
 0xab4   :  { %1591 = vtanh.f32 %v805_v13 }
 0xabb   :  { %v1586_v33 = vpop.eup %1585 }
 0xabc   :  { %v1588_v34 = vpop.eup %1587  ;;  %v818_v35 = vadd.f32 1.0, %v1586_v33 }
 0xabd   :  { %v820_v37 = vadd.f32 1.0, %v1588_v34  ;;  %v1590_v39 = vpop.eup %1589 }
 0xabe   :  { %1593 = vrcp.f32 %v818_v35  ;;  %v1592_v4 = vpop.eup %1591 }
 0xabf   :  { %1595 = vrcp.f32 %v820_v37 }
 0xac0   :  { %1597 = vpow2.f32 %v1359_v48 }
 0xac1   :  { %1599 = vpow2.f32 %v1361_v49 }
 0xac8   :  { %v1594_v41 = vpop.eup %1593 }
 0xac9   :  { %v1596_v43 = vpop.eup %1595  ;;  %v840_v44 = vmul.f32 %v1594_v41, %v1590_v39  ;;  %v838_v45 = vmul.f32 %v1594_v41, %v834_v40 }
 0xaca   :  { %v841_v46 = vmul.f32 %v1596_v43, %v1592_v4  ;;  %v839_v47 = vmul.f32 %v1596_v43, %v835_v42  ;;  %v1598_v50 = vpop.eup %1597 }
 0xacb   :  { %844 = vrot.lane.b32.xlu1 %v840_v44, %s1682_s3  ;;  %v1600_v51 = vpop.eup %1599  ;;  %v819_v52 = vadd.f32 1.0, %v1598_v50 }
 0xacc   :  { %846 = vrot.lane.b32.xlu0 %v841_v46, %s1682_s3  ;;  %v821_v53 = vadd.f32 1.0, %v1600_v51 }
 0xacd   :  { %1601 = vrcp.f32 %v819_v52 }
 0xace   :  { %1603 = vrcp.f32 %v821_v53 }
 0xad7   :  { %v1602_v58 = vpop.eup %1601 }
 0xad8   :  { %v1604_v60 = vpop.eup %1603 }
 0xb3d   :  { %v845_v54 = vpop.permute.xlu1 %844 }
 0xb3e   :  { %v847_v55 = vpop.permute.xlu0 %846  ;;  %v850_v56 = vadd.f32 %v845_v54, %v838_v45 }
 0xb3f   :  { %v851_v57 = vadd.f32 %v847_v55, %v839_v47 }
 0xb40   :  { %1605 = vtanh.f32 %v850_v56  ;;  %v954_v13 = vrot.slane %v850_v56, 7 }
 0xb41   :  { %1607 = vtanh.f32 %v851_v57  ;;  %v955_v34 = vrot.slane %v851_v57, 7 }
 0xb4a   :  { %v1606_v59 = vpop.eup %1605 }
 0xb4b   :  { %v1608_v61 = vpop.eup %1607  ;;  %v854_v62 = vmul.f32 %v1606_v59, %v1602_v58 }
 0xb4c   :  { %v855_v63 = vmul.f32 %v1608_v61, %v1604_v60 }
 0xb4d   :  { %v856_v0 = vpack.c.bf16 %v854_v62, %v854_v62 }
 0xb4e   :  { %v857_v1 = vpack.c.bf16 %v855_v63, %v855_v63 }
 0xb4f   :  { %v860_v2 = vunpack.c.l.b16 %v856_v0 }
 0xb50   :  { %v861_v5 = vunpack.c.l.b16 %v857_v1 }
 0xb51   :  { %v862_v6 = vrot.slane %v860_v2, 5 }
 0xb52   :  { %v863_v14 = vrot.slane %v861_v5, 4 }
 0xb54   :  { %v864_v15 = vsel %vm266_vm2, %v863_v14, %v862_v6 }
 0xb55   :  { %v865_v16 = vpack.c.b16 %v864_v15, %v864_v15 }
 0xb57   :  { %866 = vrot.lane.b32.xlu1 %v865_v16, %s1682_s3 }
 0xbc9   :  { %v867_v17 = vpop.permute.xlu1 %866 }
 0xbca   :  { %1362 = vmatmul.mubr.msk.bf16.vlgmr.msra.gmra.mrb[16].mxu1 %vm158_vm3, %v867_v17 }
 0xc9d   :  { %v905_v18 = vpop.f32.mrb[16].mxu1 }
 0xc9e   :  { %v914_v19 = vrot.slane %v905_v18, 2  ;;  %v916_v20 = vrot.slane %v905_v18, 3  ;;  %v907_v21 = vpop.f32.mrb[17].mxu1 }
 0xc9f   :  { %v909_v22 = vpop.f32.mrb[18].mxu1  ;;  %v915_v30 = vrot.slane %v907_v21, 2  ;;  %v917_v31 = vrot.slane %v907_v21, 3 }
 0xca0   :  { %v922_v24 = vadd.f32 %v914_v19, %v1811_v23  ;;  %v924_v26 = vadd.f32 %v916_v20, %v1813_v25  ;;  %v910_v27 = vpop.f32.mrb[19].mxu1 }
 0xca1   :  { %v923_v7 = vadd.f32 %v915_v30, %v1817_v36  ;;  %v925_v3 = vadd.f32 %v917_v31, %v1819_v38 }
 0xca2   :  { %v1363_v28 = vmul.f32 -1.442695, %v922_v24  ;;  %v1365_v29 = vmul.f32 -1.442695, %v924_v26 }
 0xca3   :  { %v1364_v41 = vmul.f32 -1.442695, %v923_v7  ;;  %v1366_v42 = vmul.f32 -1.442695, %v925_v3 }
 0xca4   :  { %1609 = vpow2.f32 %v1363_v28 }
 0xca5   :  { %1611 = vpow2.f32 %v1365_v29 }
 0xca6   :  { %1613 = vtanh.f32 %v923_v7 }
 0xca7   :  { %1615 = vtanh.f32 %v925_v3 }
 0xcae   :  { %v1610_v8 = vpop.eup %1609 }
 0xcaf   :  { %v1612_v32 = vpop.eup %1611  ;;  %v938_v9 = vadd.f32 1.0, %v1610_v8 }
 0xcb0   :  { %v940_v10 = vadd.f32 1.0, %v1612_v32  ;;  %v1614_v11 = vpop.eup %1613 }
 0xcb1   :  { %1617 = vrcp.f32 %v938_v9  ;;  %v1616_v12 = vpop.eup %1615 }
 0xcb2   :  { %1619 = vrcp.f32 %v940_v10 }
 0xcb3   :  { %1621 = vpow2.f32 %v1364_v41 }
 0xcb4   :  { %1623 = vpow2.f32 %v1366_v42 }
 0xcbb   :  { %v1618_v33 = vpop.eup %1617 }
 0xcbc   :  { %v1620_v35 = vpop.eup %1619  ;;  %v960_v37 = vmul.f32 %v1618_v33, %v1614_v11  ;;  %v958_v39 = vmul.f32 %v1618_v33, %v954_v13  ;;  %v1683_v11 = vmov 0.0   ;;  %v1455_v13 = vld [vmem:[%s2026_s4 + $0x10] sm:$0xff]   ;;  %v1456_v33 = vld [vmem:[%s2026_s4 + $0x18] sm:$0xff]  }
 0xcbd   :  { %v961_v4 = vmul.f32 %v1620_v35, %v1616_v12  ;;  %v959_v40 = vmul.f32 %v1620_v35, %v955_v34  ;;  %v1622_v43 = vpop.eup %1621  ;;  %1401 = vmatprep.subr.bf16.mxu1 %v1683_v11  ;;  %1409 = vmatprep.mubr.msk.bf16.mxu1 %vm1684_vm4, %v1683_v11  ;;  %v1454_v12 = vld [vmem:[%s2026_s4 + $0x8] sm:$0xff]  }
 0xcbe   :  { %964 = vrot.lane.b32.xlu0 %v960_v37, %s1682_s3  ;;  %v1624_v44 = vpop.eup %1623  ;;  %v939_v45 = vadd.f32 1.0, %v1622_v43  ;;  %1413 = vmatprep.subr.bf16.mxu0 %v1683_v11 }
 0xcbf   :  { %966 = vrot.lane.b32.xlu1 %v961_v4, %s1682_s3  ;;  %v941_v46 = vadd.f32 1.0, %v1624_v44 }
 0xcc0   :  { %1625 = vrcp.f32 %v939_v45 }
 0xcc1   :  { %1627 = vrcp.f32 %v941_v46 }
 0xcca   :  { %v1626_v51 = vpop.eup %1625 }
 0xccb   :  { %v1628_v52 = vpop.eup %1627 }
 0xd30   :  { %v965_v47 = vpop.permute.xlu0 %964 }
 0xd31   :  { %v967_v48 = vpop.permute.xlu1 %966  ;;  %v970_v49 = vadd.f32 %v965_v47, %v958_v39 }
 0xd32   :  { %v971_v50 = vadd.f32 %v967_v48, %v959_v40  ;;  %v1457_v48 = vld [vmem:[%s2028_s6] sm:$0xff]  }
 0xd33   :  { %1629 = vtanh.f32 %v970_v49  ;;  %v1074_v31 = vrot.slane %v970_v49, 7 }
 0xd34   :  { %1631 = vtanh.f32 %v971_v50  ;;  %v1075_v3 = vrot.slane %v971_v50, 7 }
 0xd3d   :  { %v1630_v53 = vpop.eup %1629 }
 0xd3e   :  { %v1632_v54 = vpop.eup %1631  ;;  %v974_v55 = vmul.f32 %v1630_v53, %v1626_v51 }
 0xd3f   :  { %v975_v56 = vmul.f32 %v1632_v54, %v1628_v52  ;;  %v1458_v52 = vld [vmem:[%s2028_s6 + $0x8] sm:$0xff]  }
 0xd40   :  { %v976_v57 = vpack.c.bf16 %v974_v55, %v974_v55 }
 0xd41   :  { %v977_v58 = vpack.c.bf16 %v975_v56, %v975_v56 }
 0xd42   :  { %v980_v60 = vunpack.c.l.b16 %v976_v57  ;;  %v1459_v57 = vld [vmem:[%s2028_s6 + $0x10] sm:$0xff]  }
 0xd43   :  { %v981_v59 = vunpack.c.l.b16 %v977_v58 }
 0xd44   :  { %v982_v61 = vrot.slane %v980_v60, 6 }
 0xd45   :  { %v983_v62 = vrot.slane %v981_v59, 5 }
 0xd47   :  { %v984_v63 = vsel %vm266_vm2, %v983_v62, %v982_v61  ;;  %v1460_v61 = vld [vmem:[%s2028_s6 + $0x18] sm:$0xff]  }
 0xd48   :  { %v985_v0 = vpack.c.b16 %v984_v63, %v984_v63  ;;  %v1461_v63 = vld [vmem:[%s2028_s6 + $0x20] sm:$0xff]  }
 0xd4a   :  { %986 = vrot.lane.b32.xlu0 %v985_v0, %s1682_s3  ;;  %v1462_v0 = vld [vmem:[%s2028_s6 + $0x28] sm:$0xff]  }
 0xdbc   :  { %v987_v1 = vpop.permute.xlu0 %986 }
 0xdbd   :  { %1367 = vmatmul.mubr.msk.bf16.vlgmr.msra.gmra.mrb[12].mxu0 %vm158_vm3, %v987_v1 }
 0xdbe   :  { %1429 = vmatprep.mubr.msk.bf16.mxu0 %vm1684_vm4, %v1683_v11  ;;  %1414 = vmatpush3.bf16.msra.mxu0 %v1457_v48 }
 0xdbf   :  { %1415 = vmatprep.subr.bf16.mxu0 %v1683_v11 }
 0xdc2   :  { %1416 = vmatpush3.bf16.msra.mxu0 %v1458_v52 }
 0xdc3   :  { %1417 = vmatprep.subr.bf16.mxu0 %v1683_v11 }
 0xdc6   :  { %1418 = vmatpush3.bf16.msra.mxu0 %v1459_v57 }
 0xdc7   :  { %1419 = vmatprep.subr.bf16.mxu0 %v1683_v11 }
 0xdca   :  { %1420 = vmatpush3.bf16.msra.mxu0 %v1460_v61 }
 0xdcb   :  { %1421 = vmatprep.subr.bf16.mxu0 %v1683_v11 }
 0xdce   :  { %1422 = vmatpush3.bf16.msra.mxu0 %v1461_v63 }
 0xdcf   :  { %1423 = vmatprep.subr.bf16.mxu0 %v1683_v11 }
 0xdd2   :  { %1424 = vmatpush3.bf16.msra.mxu0 %v1462_v0 }
 0xdd3   :  { %1425 = vmatprep.subr.bf16.mxu0 %v1683_v11 }
 0xe90   :  { %v1025_v2 = vpop.f32.mrb[12].mxu0 }
 0xe91   :  { %v1034_v5 = vrot.slane %v1025_v2, 1  ;;  %v1036_v6 = vrot.slane %v1025_v2, 2  ;;  %v1027_v14 = vpop.f32.mrb[13].mxu0  ;;  %v1463_v2 = vld [vmem:[%s2028_s6 + $0x30] sm:$0xff]  }
 0xe92   :  { %v1029_v15 = vpop.f32.mrb[14].mxu0  ;;  %v1035_v21 = vrot.slane %v1027_v14, 1  ;;  %v1037_v22 = vrot.slane %v1027_v14, 2  ;;  %1426 = vmatpush3.bf16.msra.mxu0 %v1463_v2 }
 0xe93   :  { %v1042_v16 = vadd.f32 %v1034_v5, %v1811_v23  ;;  %v1044_v17 = vadd.f32 %v1036_v6, %v1813_v25  ;;  %v1030_v18 = vpop.f32.mrb[15].mxu0  ;;  %1427 = vmatprep.subr.bf16.mxu0 %v1683_v11  ;;  %v1464_v5 = vld [vmem:[%s2028_s6 + $0x38] sm:$0xff]   ;;  %v1372_v6 = vld [vmem:[%s2027_s5] ss:$0 sm:$0xff]  ;;  %s1312_s6 = sshll.u32 %s1685_s25, 4  ;;  %s1313_s6 = int_to_ptr.vmem [resolvable:$true] %s1312_s6 }
 0xe94   :  { %v1043_v24 = vadd.f32 %v1035_v21, %v1817_v36  ;;  %v1045_v26 = vadd.f32 %v1037_v22, %v1819_v38  ;;  %v1453_v38 = vld [vmem:[%s2026_s4] sm:$0xff]   ;;  %s1657_s5 = scalar_lea.vmem %s1313_s6, 32  ;;  %p1662_p1 = scmp.lt.s32.totalorder %s1313_s6, %s1313_s6 }
 0xe95   :  { %v1368_v19 = vmul.f32 -1.442695, %v1042_v16  ;;  %v1370_v20 = vmul.f32 -1.442695, %v1044_v17  ;;  %1402 = vmatpush3.bf16.msra.mxu1 %v1453_v38  ;;  %v1378_v21 = vld [vmem:[%s2029_s7] ss:$0 sm:$0xff]  ;;  %p1658_p0 = scmp.ne.s32.totalorder %s1313_s6, %s1657_s5  ;;  %p1663_p2 = scmp.lt.s32.totalorder %s1657_s5, %s1657_s5 }
 0xe96   :  { %1403 = vmatprep.subr.bf16.mxu1 %v1683_v11  ;;  %v1369_v34 = vmul.f32 -1.442695, %v1043_v24  ;;  %v1371_v35 = vmul.f32 -1.442695, %v1045_v26  ;;  %1428 = vmatpush3.bf16.msra.mxu0 %v1464_v5 }
 0xe97   :  { %1633 = vpow2.f32 %v1368_v19  ;;  %p1664_p3 = por %p1663_p2, %p1662_p1 }
 0xe98   :  { %1635 = vpow2.f32 %v1370_v20 }
 0xe99   :  { %1637 = vtanh.f32 %v1043_v24  ;;  %1404 = vmatpush3.bf16.msra.mxu1 %v1454_v12  ;;  %p1665_p4 = pnand %p1664_p3, %p1658_p0 }
 0xe9a   :  { %1639 = vtanh.f32 %v1045_v26  ;;  %1405 = vmatprep.subr.bf16.mxu1 %v1683_v11 }
 0xe9d   :  { %1406 = vmatpush3.bf16.msra.mxu1 %v1455_v13 }
 0xe9e   :  { %1407 = vmatprep.subr.bf16.mxu1 %v1683_v11 }
 0xea1   :  { %v1634_v27 = vpop.eup %1633  ;;  %1408 = vmatpush3.bf16.msra.mxu1 %v1456_v33 }
 0xea2   :  { %v1636_v28 = vpop.eup %1635  ;;  %v1058_v29 = vadd.f32 1.0, %v1634_v27 }
 0xea3   :  { %v1060_v30 = vadd.f32 1.0, %v1636_v28  ;;  %v1638_v23 = vpop.eup %1637 }
 0xea4   :  { %1641 = vrcp.f32 %v1058_v29  ;;  %v1640_v25 = vpop.eup %1639 }
 0xea5   :  { %1643 = vrcp.f32 %v1060_v30 }
 0xea6   :  { %1645 = vpow2.f32 %v1369_v34 }
 0xea7   :  { %1647 = vpow2.f32 %v1371_v35 }
 0xeae   :  { %v1642_v7 = vpop.eup %1641 }
 0xeaf   :  { %v1644_v8 = vpop.eup %1643  ;;  %v1080_v32 = vmul.f32 %v1642_v7, %v1638_v23  ;;  %v1078_v9 = vmul.f32 %v1642_v7, %v1074_v31 }
 0xeb0   :  { %v1081_v10 = vmul.f32 %v1644_v8, %v1640_v25  ;;  %v1079_v36 = vmul.f32 %v1644_v8, %v1075_v3  ;;  %v1646_v37 = vpop.eup %1645 }
 0xeb1   :  { %1084 = vrot.lane.b32.xlu1 %v1080_v32, %s1682_s3  ;;  %v1648_v39 = vpop.eup %1647  ;;  %v1059_v4 = vadd.f32 1.0, %v1646_v37 }
 0xeb2   :  { %1086 = vrot.lane.b32.xlu0 %v1081_v10, %s1682_s3  ;;  %v1061_v40 = vadd.f32 1.0, %v1648_v39 }
 0xeb3   :  { %1649 = vrcp.f32 %v1059_v4 }
 0xeb4   :  { %1651 = vrcp.f32 %v1061_v40 }
 0xebd   :  { %v1650_v45 = vpop.eup %1649 }
 0xebe   :  { %v1652_v46 = vpop.eup %1651 }
 0xf23   :  { %v1085_v41 = vpop.permute.xlu1 %1084 }
 0xf24   :  { %v1087_v42 = vpop.permute.xlu0 %1086  ;;  %v1090_v43 = vadd.f32 %v1085_v41, %v1078_v9 }
 0xf25   :  { %v1091_v44 = vadd.f32 %v1087_v42, %v1079_v36 }
 0xf26   :  { %1653 = vtanh.f32 %v1090_v43 }
 0xf27   :  { %1655 = vtanh.f32 %v1091_v44 }
 0xf30   :  { %v1654_v47 = vpop.eup %1653 }
 0xf31   :  { %v1656_v49 = vpop.eup %1655  ;;  %v1094_v50 = vmul.f32 %v1654_v47, %v1650_v45 }
 0xf32   :  { %v1095_v51 = vmul.f32 %v1656_v49, %v1652_v46 }
 0xf33   :  { %v1096_v53 = vpack.c.bf16 %v1094_v50, %v1094_v50 }
 0xf34   :  { %v1097_v54 = vpack.c.bf16 %v1095_v51, %v1095_v51 }
 0xf35   :  { %v1115_v55 = vunpack.c.l.b16 %v1096_v53 }
 0xf36   :  { %v1116_v56 = vunpack.c.l.b16 %v1097_v54 }
 0xf37   :  { %v1117_v58 = vrot.slane %v1115_v55, 7 }
 0xf38   :  { %v1118_v60 = vrot.slane %v1116_v56, 6 }
 0xf3a   :  { %v1119_v59 = vsel %vm266_vm2, %v1118_v60, %v1117_v58 }
 0xf3b   :  { %v1120_v62 = vpack.c.b16 %v1119_v59, %v1119_v59 }
 0xf3d   :  { %1121 = vrot.lane.b32.xlu1 %v1120_v62, %s1682_s3 }
 0xfaf   :  { %v1122_v1 = vpop.permute.xlu1 %1121 }
 0xfb0   :  { %1410 = vmatmul.mubr.msk.bf16.vlgmr.msra.gmra.mrb[20].mxu1 %vm158_vm3, %v1122_v1 }
0x1083   :  { %v1184_v14 = vpop.f32.mrb[20].mxu1 }
0x1084   :  { %v1185_v15 = vadd.f32 %v1372_v6, %v1184_v14  ;;  %v1411_v16 = vpop.f32.mrb[21].mxu1 }
0x1085   :  { %v1187_v17 = vpop.f32.mrb[22].mxu1 }
0x1086   :  { %v1190_v18 = vmax.f32 %v1185_v15, 0.0  ;;  %v1412_v19 = vpop.f32.mrb[23].mxu1 }
0x1088   :  { %v1191_v20 = vpack.c.bf16 %v1190_v18, %v1190_v18 }
0x108a   :  { %1430 = vmatmul.mubr.bf16.vlgmr.msra.gmra.mrb[16].mxu0 %v1191_v20 }
0x115d   :  { %v1297_v22 = vpop.f32.mrb[16].mxu0 }
0x115e   :  { %v1298_v24 = vadd.f32 %v1378_v21, %v1297_v22  ;;  %v1431_v26 = vpop.f32.mrb[17].mxu0 }
0x115f   :  { %v1300_v27 = vpop.f32.mrb[18].mxu0 }
0x1160   :  { %v1303_v28 = vmax.f32 %v1298_v24, 0.0  ;;  %v1432_v29 = vpop.f32.mrb[19].mxu0 }
0x1162   :  { %1305 = vst.msk [vmem:[#allocation2] sm:$0x3] %vm1304_vm5, %v1303_v28 }
0x1163   :  { %1668 = shalt.err (!%p1665_p4)
}
0x1164   :  { %s1669_s27 = scalar_lea.hbm %s2030_s8, 32 }
0x1165   :  { %p1670_p5 = scmp.ne.s32.totalorder %s2030_s8, %s1669_s27  ;;  %p1673_p6 = scmp.lt.u32.totalorder %s1669_s27, %s2030_s8 }
0x1167   :  { %p1675_p7 = pnand %p1673_p6, %p1670_p5 }
0x1169   :  { %1678 = shalt.err (!%p1675_p7)
}
0x116a   :  { %1315 = dma.vmem_to_hbm [thread:$0]  %s1313_s6, 32, %s2030_s8, [#allocation3]  }
0x116b   :  { %1679 = dma.done.wait [#allocation3], 32  }
0x116c   :  { %1680 = vsyncadd [#allocation3], 4294967264 }
0x116d   :  { %1319 = vsyncpa [#allocation3], 1 }

</bundles_post_ra>
